<compile_context>
chip_gen: v6e
topology: v6e:2x2x1
jax: 0.10.0
libtpu: 0.0.40
codegen_flags: <defaults>
</compile_context>

<pallas_src>
import functools

import jax
import jax.numpy as jnp
from jax.experimental import pallas as pl
from jax.experimental.pallas import tpu as pltpu


LANE = 128


def _round_up(x, m):
    return ((x + m - 1) // m) * m


def _cdiv(a, b):
    return (a + b - 1) // b


def _policy_kernel(x_ref, w1_ref, wmid_ref, w5_ref, bias_ref, out_ref, *,
                   action_dim):
    """One batch tile of the 5-layer MLP + softmax (all dims lane-padded).

    x_ref    : (TB, F)        f32 (cast to bf16 inside)
    w1_ref   : (F, Hp)        compute dtype (bf16 or f32), Hp = 128-padded
    wmid_ref : (3, Hp, Hp)    compute dtype  (packed layers 2..4)
    w5_ref   : (Hp, Ap)       compute dtype, Ap = 128-padded action dim
    bias_ref : (5, max(Hp,Ap)) f32           (packed biases, zero padded)
    out_ref  : (TB, Ap)       f32            (padded action lanes -> 0)
    """
    hidden_p = w1_ref.shape[1]
    act_p = w5_ref.shape[1]
    cdt = w1_ref.dtype  # matmul operand dtype

    bias = bias_ref[...]  # tiny (5, bw) f32 slab, one load

    # layer 1: (TB, F) @ (F, Hp); cast x on the VPU under the pipeline
    h = jnp.dot(x_ref[...].astype(cdt), w1_ref[...],
                preferred_element_type=jnp.float32)
    h = jnp.maximum(h + bias[0:1, :hidden_p], 0.0)

    # layers 2..4 (packed (3, Hp, Hp)); unrolled at trace time.
    # Zero-padded hidden channels stay exactly 0 (zero weights + zero bias).
    for l in range(3):
        h = jnp.dot(h.astype(cdt), wmid_ref[l],
                    preferred_element_type=jnp.float32)
        h = jnp.maximum(h + bias[l + 1:l + 2, :hidden_p], 0.0)

    # layer 5 -> logits (no ReLU)
    logits = jnp.dot(h.astype(cdt), w5_ref[...],
                     preferred_element_type=jnp.float32)
    logits = logits + bias[4:5, :act_p]

    # mask padded action lanes so they contribute 0 to the softmax denominator
    lane = jax.lax.broadcasted_iota(jnp.int32, logits.shape, 1)
    logits = jnp.where(lane < action_dim, logits, -jnp.inf)

    # softmax over dim=1 (actions), f32.  Exact reciprocal: rows sum to 1.
    m = jnp.max(logits, axis=-1, keepdims=True)
    e = jnp.exp(logits - m)                       # padded lanes -> exp(-inf)=0
    inv = pl.reciprocal(jnp.sum(e, axis=-1, keepdims=True), approx=False)
    out_ref[...] = (e * inv).astype(out_ref.dtype)


def pack_params(params, *, use_bf16=True):
    """One-time packing/padding/casting of the 5 Linear layers.

    Returns (w1, wmid, w5, bias) with hidden/action dims zero-padded to 128
    lanes and matmul operands cast to bf16 (f32 accumulate in the kernel).
    Call once and reuse across forward calls (keeps per-call dispatch to just
    the pallas_call).
    """
    (w1, b1), (w2, b2), (w3, b3), (w4, b4), (w5, b5) = params
    F, H = w1.shape
    A = w5.shape[1]
    Hp = _round_up(max(H, LANE), LANE)
    Ap = _round_up(max(A, LANE), LANE)
    cdt = jnp.bfloat16 if use_bf16 else jnp.float32

    w1p = jnp.zeros((F, Hp), jnp.float32).at[:, :H].set(w1)
    wmid = jnp.zeros((3, Hp, Hp), jnp.float32)
    wmid = (wmid.at[0, :H, :H].set(w2)
                 .at[1, :H, :H].set(w3)
                 .at[2, :H, :H].set(w4))
    w5p = jnp.zeros((Hp, Ap), jnp.float32).at[:H, :A].set(w5)

    bw = max(Hp, Ap)
    bias = jnp.zeros((5, bw), jnp.float32)
    bias = (bias.at[0, :H].set(b1).at[1, :H].set(b2)
                 .at[2, :H].set(b3).at[3, :H].set(b4)
                 .at[4, :A].set(b5))

    return (w1p.astype(cdt), wmid.astype(cdt), w5p.astype(cdt), bias)


@functools.partial(jax.jit, static_argnames=("action_dim", "batch_tile"))
def policy_forward(state, packed, action_dim, *, batch_tile=512):
    """state: (B, 1, H, W) float32.  Returns probs (B, action_dim) float32."""
    B = state.shape[0]
    x = state.reshape(B, -1).astype(jnp.float32)   # x.view(x.size(0), -1)
    F = x.shape[1]

    w1c, wmid, w5c, bias = packed
    Hp = w1c.shape[1]
    Ap = w5c.shape[1]
    bw = bias.shape[1]

    # ---- batch tiling ------------------------------------------------------
    # Pad B to a 16-aligned tile.  For large B, cap the tile so the grid has
    # at least 2 steps (v7x has 2 TCs; "parallel" shards grid steps across
    # them).  Weights stay VMEM-resident (constant index_maps), so bigger
    # tiles are pure amortization of the ~0.35us/step grid overhead.
    tb_cap = _round_up(B, 16)
    if B > 16:
        tb_cap = max(16, _round_up(_cdiv(B, 2), 16))
    tb = _round_up(min(batch_tile, tb_cap), 16)
    B_pad = _round_up(B, tb)
    xp = x if B_pad == B else jnp.pad(x, ((0, B_pad - B), (0, 0)))

    grid = (B_pad // tb,)
    kernel = functools.partial(_policy_kernel, action_dim=action_dim)

    out = pl.pallas_call(
        kernel,
        out_shape=jax.ShapeDtypeStruct((B_pad, Ap), jnp.float32),
        grid_spec=pltpu.PrefetchScalarGridSpec(
            num_scalar_prefetch=0,
            grid=grid,
            in_specs=[
                # activations: streamed per batch tile (f32, cast in-kernel)
                pl.BlockSpec((tb, F), lambda i: (i, 0)),
                # weights/biases: constant block -> VMEM-resident across grid
                pl.BlockSpec((F, Hp), lambda i: (0, 0)),
                pl.BlockSpec((3, Hp, Hp), lambda i: (0, 0, 0)),
                pl.BlockSpec((Hp, Ap), lambda i: (0, 0)),
                pl.BlockSpec((5, bw), lambda i: (0, 0)),
            ],
            out_specs=pl.BlockSpec((tb, Ap), lambda i: (i, 0)),
        ),
        compiler_params=pltpu.CompilerParams(
            dimension_semantics=("parallel",)),
    )(xp, w1c, wmid, w5c, bias)

    return out[:B, :action_dim]


def init_params(key, state_dim, action_dim, hidden_dim):
    """Deterministic PyTorch-style (uniform +-1/sqrt(fan_in)) init, f32."""
    linear_in = state_dim[0] * state_dim[1]
    dims = [linear_in, hidden_dim, hidden_dim, hidden_dim, hidden_dim,
            action_dim]
    params = []
    for i in range(5):
        fan_in, fan_out = dims[i], dims[i + 1]
        key, kw, kb = jax.random.split(key, 3)
        bound = 1.0 / jnp.sqrt(fan_in)
        # stored (in, out) so the kernel does x @ W
        w = jax.random.uniform(kw, (fan_in, fan_out), jnp.float32,
                               -bound, bound)
        b = jax.random.uniform(kb, (fan_out,), jnp.float32, -bound, bound)
        params.append((w, b))
    return params


def _reference_forward(state, params):
    """Pure-JAX f32 reference of the PyTorch forward()."""
    h = state.reshape(state.shape[0], -1)
    for i, (w, b) in enumerate(params):
        h = h @ w + b
        if i < len(params) - 1:
            h = jnp.maximum(h, 0.0)
    return jax.nn.softmax(h, axis=1)


if __name__ == "__main__":
    # Small shapes consistent with the module: state_dim=(16,16), hidden=32,
    # action_dim=4 (snake: up/down/left/right), batch=2.
    state_dim = (16, 16)
    action_dim = 4
    hidden_dim = 32
    batch = 2

    key = jax.random.PRNGKey(0)
    key, k_state = jax.random.split(key)
    state = jax.random.normal(k_state, (batch, 1) + state_dim, jnp.float32)

    params = init_params(key, state_dim, action_dim, hidden_dim)
    packed = pack_params(params)           # one-time pack/pad/cast

    probs = policy_forward(state, packed, action_dim)
    probs = jax.block_until_ready(probs)

    # sanity: shape, softmax rows sum to 1 (exact reciprocal), close to f32 ref
    assert probs.shape == (batch, action_dim)
    assert jnp.allclose(jnp.sum(probs, axis=1), 1.0, atol=1e-5)
    ref = _reference_forward(state, params)
    assert jnp.allclose(probs, ref, atol=2e-2)

    # also exercise the multi-tile grid path (padding + masked action lanes)
    key, k_state2 = jax.random.split(key)
    state2 = jax.random.normal(k_state2, (48, 1) + state_dim, jnp.float32)
    probs2 = jax.block_until_ready(policy_forward(state2, packed, action_dim))
    assert probs2.shape == (48, action_dim)
    assert jnp.allclose(jnp.sum(probs2, axis=1), 1.0, atol=1e-5)
    assert jnp.allclose(probs2, _reference_forward(state2, params), atol=2e-2)

    print("KERNEL_OK")
</pallas_src>

<mosaic_0001>
module attributes {stable_mosaic.version = 11 : i64} {
  func.func @_policy_kernel(%arg0: i32, %arg1: memref<16x256xf32, #tpu.memory_space<vmem>>, %arg2: memref<256x128xbf16, #tpu.memory_space<vmem>>, %arg3: memref<3x128x128xbf16, #tpu.memory_space<vmem>>, %arg4: memref<128x128xbf16, #tpu.memory_space<vmem>>, %arg5: memref<5x128xf32, #tpu.memory_space<vmem>>, %arg6: memref<16x128xf32, #tpu.memory_space<vmem>>) attributes {dimension_semantics = [#tpu.dimension_semantics<parallel>], iteration_bounds = array<i64: 1>, scalar_prefetch = 0 : i64, scratch_operands = 0 : i64, tpu.core_type = #tpu.core_type<tc>, window_params = [{transform_indices = @transform_0, window_bounds = array<i64: 16, 256>}, {pipeline_mode = #tpu.pipeline_mode<synchronous>, transform_indices = @transform_1, window_bounds = array<i64: 256, 128>}, {pipeline_mode = #tpu.pipeline_mode<synchronous>, transform_indices = @transform_2, window_bounds = array<i64: 3, 128, 128>}, {pipeline_mode = #tpu.pipeline_mode<synchronous>, transform_indices = @transform_3, window_bounds = array<i64: 128, 128>}, {pipeline_mode = #tpu.pipeline_mode<synchronous>, transform_indices = @transform_4, window_bounds = array<i64: 5, 128>}, {transform_indices = @transform_5, window_bounds = array<i64: 16, 128>}]} {
    %c0 = arith.constant 0 : index
    %c0_0 = arith.constant 0 : index
    %0 = vector.load %arg5[%c0, %c0_0] : memref<5x128xf32, #tpu.memory_space<vmem>>, vector<5x128xf32>
    %c0_1 = arith.constant 0 : index
    %c0_2 = arith.constant 0 : index
    %1 = vector.load %arg1[%c0_1, %c0_2] : memref<16x256xf32, #tpu.memory_space<vmem>>, vector<16x256xf32>
    %2 = arith.truncf %1 : vector<16x256xf32> to vector<16x256xbf16>
    %c0_3 = arith.constant 0 : index
    %c0_4 = arith.constant 0 : index
    %3 = vector.load %arg2[%c0_3, %c0_4] : memref<256x128xbf16, #tpu.memory_space<vmem>>, vector<256x128xbf16>
    %cst = arith.constant dense<0.000000e+00> : vector<16x128xf32>
    %4 = tpu.matmul %2, %3, %cst {dimension_numbers = #tpu.dot_dimension_numbers<[1], [0], [0], [1], [0, 0, 1, 1], [], []>} : vector<16x256xbf16>, vector<256x128xbf16>, vector<16x128xf32> -> vector<16x128xf32>
    %5 = vector.extract_strided_slice %0 {offsets = [0, 0], sizes = [1, 128], strides = [1, 1]} : vector<5x128xf32> to vector<1x128xf32>
    %6 = vector.broadcast %5 : vector<1x128xf32> to vector<16x128xf32>
    %7 = arith.addf %4, %6 : vector<16x128xf32>
    %cst_5 = arith.constant 0.000000e+00 : f32
    %8 = vector.broadcast %cst_5 : f32 to vector<16x128xf32>
    %9 = arith.maximumf %7, %8 : vector<16x128xf32>
    %10 = arith.truncf %9 : vector<16x128xf32> to vector<16x128xbf16>
    %c0_6 = arith.constant 0 : index
    %c0_7 = arith.constant 0 : index
    %c0_8 = arith.constant 0 : index
    %11 = vector.load %arg3[%c0_6, %c0_7, %c0_8] : memref<3x128x128xbf16, #tpu.memory_space<vmem>>, vector<1x128x128xbf16>
    %12 = vector.shape_cast %11 : vector<1x128x128xbf16> to vector<128x128xbf16>
    %cst_9 = arith.constant dense<0.000000e+00> : vector<16x128xf32>
    %13 = tpu.matmul %10, %12, %cst_9 {dimension_numbers = #tpu.dot_dimension_numbers<[1], [0], [0], [1], [0, 0, 1, 1], [], []>} : vector<16x128xbf16>, vector<128x128xbf16>, vector<16x128xf32> -> vector<16x128xf32>
    %14 = vector.extract_strided_slice %0 {offsets = [1, 0], sizes = [1, 128], strides = [1, 1]} : vector<5x128xf32> to vector<1x128xf32>
    %15 = vector.broadcast %14 : vector<1x128xf32> to vector<16x128xf32>
    %16 = arith.addf %13, %15 : vector<16x128xf32>
    %cst_10 = arith.constant 0.000000e+00 : f32
    %17 = vector.broadcast %cst_10 : f32 to vector<16x128xf32>
    %18 = arith.maximumf %16, %17 : vector<16x128xf32>
    %19 = arith.truncf %18 : vector<16x128xf32> to vector<16x128xbf16>
    %c1 = arith.constant 1 : index
    %c0_11 = arith.constant 0 : index
    %c0_12 = arith.constant 0 : index
    %20 = vector.load %arg3[%c1, %c0_11, %c0_12] : memref<3x128x128xbf16, #tpu.memory_space<vmem>>, vector<1x128x128xbf16>
    %21 = vector.shape_cast %20 : vector<1x128x128xbf16> to vector<128x128xbf16>
    %cst_13 = arith.constant dense<0.000000e+00> : vector<16x128xf32>
    %22 = tpu.matmul %19, %21, %cst_13 {dimension_numbers = #tpu.dot_dimension_numbers<[1], [0], [0], [1], [0, 0, 1, 1], [], []>} : vector<16x128xbf16>, vector<128x128xbf16>, vector<16x128xf32> -> vector<16x128xf32>
    %23 = vector.extract_strided_slice %0 {offsets = [2, 0], sizes = [1, 128], strides = [1, 1]} : vector<5x128xf32> to vector<1x128xf32>
    %24 = vector.broadcast %23 : vector<1x128xf32> to vector<16x128xf32>
    %25 = arith.addf %22, %24 : vector<16x128xf32>
    %cst_14 = arith.constant 0.000000e+00 : f32
    %26 = vector.broadcast %cst_14 : f32 to vector<16x128xf32>
    %27 = arith.maximumf %25, %26 : vector<16x128xf32>
    %28 = arith.truncf %27 : vector<16x128xf32> to vector<16x128xbf16>
    %c2 = arith.constant 2 : index
    %c0_15 = arith.constant 0 : index
    %c0_16 = arith.constant 0 : index
    %29 = vector.load %arg3[%c2, %c0_15, %c0_16] : memref<3x128x128xbf16, #tpu.memory_space<vmem>>, vector<1x128x128xbf16>
    %30 = vector.shape_cast %29 : vector<1x128x128xbf16> to vector<128x128xbf16>
    %cst_17 = arith.constant dense<0.000000e+00> : vector<16x128xf32>
    %31 = tpu.matmul %28, %30, %cst_17 {dimension_numbers = #tpu.dot_dimension_numbers<[1], [0], [0], [1], [0, 0, 1, 1], [], []>} : vector<16x128xbf16>, vector<128x128xbf16>, vector<16x128xf32> -> vector<16x128xf32>
    %32 = vector.extract_strided_slice %0 {offsets = [3, 0], sizes = [1, 128], strides = [1, 1]} : vector<5x128xf32> to vector<1x128xf32>
    %33 = vector.broadcast %32 : vector<1x128xf32> to vector<16x128xf32>
    %34 = arith.addf %31, %33 : vector<16x128xf32>
    %cst_18 = arith.constant 0.000000e+00 : f32
    %35 = vector.broadcast %cst_18 : f32 to vector<16x128xf32>
    %36 = arith.maximumf %34, %35 : vector<16x128xf32>
    %37 = arith.truncf %36 : vector<16x128xf32> to vector<16x128xbf16>
    %c0_19 = arith.constant 0 : index
    %c0_20 = arith.constant 0 : index
    %38 = vector.load %arg4[%c0_19, %c0_20] : memref<128x128xbf16, #tpu.memory_space<vmem>>, vector<128x128xbf16>
    %cst_21 = arith.constant dense<0.000000e+00> : vector<16x128xf32>
    %39 = tpu.matmul %37, %38, %cst_21 {dimension_numbers = #tpu.dot_dimension_numbers<[1], [0], [0], [1], [0, 0, 1, 1], [], []>} : vector<16x128xbf16>, vector<128x128xbf16>, vector<16x128xf32> -> vector<16x128xf32>
    %40 = vector.extract_strided_slice %0 {offsets = [4, 0], sizes = [1, 128], strides = [1, 1]} : vector<5x128xf32> to vector<1x128xf32>
    %41 = vector.broadcast %40 : vector<1x128xf32> to vector<16x128xf32>
    %42 = arith.addf %39, %41 : vector<16x128xf32>
    %43 = tpu.iota {dimensions = array<i32: 1>} : vector<16x128xi32>
    %c4_i32 = arith.constant 4 : i32
    %44 = vector.broadcast %c4_i32 : i32 to vector<16x128xi32>
    %45 = arith.cmpi slt, %43, %44 : vector<16x128xi32>
    %cst_22 = arith.constant 0xFF800000 : f32
    %46 = vector.broadcast %cst_22 : f32 to vector<16x128xf32>
    %47 = arith.select %45, %42, %46 : vector<16x128xi1>, vector<16x128xf32>
    %cst_23 = arith.constant dense<0xFF800000> : vector<16xf32>
    %48 = vector.multi_reduction <maximumf>, %47, %cst_23 [1] : vector<16x128xf32> to vector<16xf32>
    %49 = vector.shape_cast %48 : vector<16xf32> to vector<16x1xf32>
    %50 = vector.broadcast %49 : vector<16x1xf32> to vector<16x128xf32>
    %51 = arith.subf %47, %50 : vector<16x128xf32>
    %52 = math.exp %51 : vector<16x128xf32>
    %cst_24 = arith.constant dense<0.000000e+00> : vector<16xf32>
    %53 = vector.multi_reduction <add>, %52, %cst_24 [1] : vector<16x128xf32> to vector<16xf32>
    %54 = vector.shape_cast %53 : vector<16xf32> to vector<16x1xf32>
    %55 = tpu.reciprocal %54 : vector<16x1xf32> -> vector<16x1xf32>
    %56 = vector.broadcast %55 : vector<16x1xf32> to vector<16x128xf32>
    %57 = arith.mulf %52, %56 : vector<16x128xf32>
    %c0_25 = arith.constant 0 : index
    %c0_26 = arith.constant 0 : index
    %58 = vector.load %arg6[%c0_25, %c0_26] : memref<16x128xf32, #tpu.memory_space<vmem>>, vector<16x128xf32>
    tpu.vector_store %arg6[%c0_25, %c0_26], %57 {strides = array<i32>} : memref<16x128xf32, #tpu.memory_space<vmem>>, vector<16x128xf32>,
    return
  }
  func.func @transform_0(%arg0: i32) -> (i32, i32) {
    %c0_i32 = arith.constant 0 : i32
    %c0_i32_0 = arith.constant 0 : i32
    return %arg0, %c0_i32 : i32, i32
  }
  func.func @transform_1(%arg0: i32) -> (i32, i32) {
    %c0_i32 = arith.constant 0 : i32
    %c0_i32_0 = arith.constant 0 : i32
    %c0_i32_1 = arith.constant 0 : i32
    return %c0_i32, %c0_i32_0 : i32, i32
  }
  func.func @transform_2(%arg0: i32) -> (i32, i32, i32) {
    %c0_i32 = arith.constant 0 : i32
    %c0_i32_0 = arith.constant 0 : i32
    %c0_i32_1 = arith.constant 0 : i32
    %c0_i32_2 = arith.constant 0 : i32
    return %c0_i32, %c0_i32_0, %c0_i32_1 : i32, i32, i32
  }
  func.func @transform_3(%arg0: i32) -> (i32, i32) {
    %c0_i32 = arith.constant 0 : i32
    %c0_i32_0 = arith.constant 0 : i32
    %c0_i32_1 = arith.constant 0 : i32
    return %c0_i32, %c0_i32_0 : i32, i32
  }
  func.func @transform_4(%arg0: i32) -> (i32, i32) {
    %c0_i32 = arith.constant 0 : i32
    %c0_i32_0 = arith.constant 0 : i32
    %c0_i32_1 = arith.constant 0 : i32
    return %c0_i32, %c0_i32_0 : i32, i32
  }
  func.func @transform_5(%arg0: i32) -> (i32, i32) {
    %c0_i32 = arith.constant 0 : i32
    %c0_i32_0 = arith.constant 0 : i32
    return %arg0, %c0_i32 : i32, i32
  }
}

</mosaic_0001>

<bundles_post_ra>
// kernel: policy_forward.1
= control target key start
LH: loop header
LB: loop body
LE: loop exit
PB: predicated region body
PF: predicated region fallthrough
CT: control target
= control target key end

     0   :  { %10 = vsyncpa [#allocation3], 0  ;;  %s1145_s0 = inlined_call_operand.vmem [shape: f32[16,256], index: 0, kind: input, shape index: {}]   ;;  %s1146_s1 = inlined_call_operand.hbm [shape: bf16[256,128], index: 1, kind: input, shape index: {}]   ;;  %s1147_s2 = inlined_call_operand.hbm [shape: bf16[3,128,128], index: 2, kind: input, shape index: {}]   ;;  %s1148_s3 = inlined_call_operand.vmem [shape: bf16[128,128], index: 3, kind: input, shape index: {}]   ;;  %s1149_s4 = inlined_call_operand.vmem [shape: f32[5,128], index: 4, kind: input, shape index: {}]   ;;  %s1150_s5 = inlined_call_operand.vmem [shape: f32[16,128], index: 5, kind: output, shape index: {}]  }
   0x1   :  { %11 = vsyncpa [#allocation5], 0  ;;  %s1002_s18 = smov [#allocation2]  }
   0x2   :  { %s19_s19 = sshll.u32 %s1002_s18, 4  ;;  %s20_s19 = int_to_ptr.vmem [resolvable:$true] %s19_s19 }
   0x3   :  { %s966_s20 = scalar_lea.vmem %s20_s19, 2048  ;;  %p971_p1 = scmp.lt.s32.totalorder %s20_s19, %s20_s19 }
   0x4   :  { %p967_p0 = scmp.ne.s32.totalorder %s20_s19, %s966_s20  ;;  %p972_p2 = scmp.lt.s32.totalorder %s966_s20, %s966_s20 }
   0x6   :  { %p973_p3 = por %p972_p2, %p971_p1 }
   0x8   :  { %p974_p4 = pnand %p973_p3, %p967_p0 }
   0xa   :  { %977 = shalt.err (!%p974_p4)
}
   0xb   :  { %s1003_s21 = smov 64   ;;  %s1004_s22 = smov 4  }
   0xc   :  { %25 = dma.hbm_to_vmem [thread:$0]  %s1146_s1, 2048, %s20_s19, [#allocation3], %s1003_s21, %s1003_s21, %s1004_s22  }
   0xd   :  { %s1005_s25 = smov [#allocation4]  }
   0xe   :  { %s31_s26 = sshll.u32 %s1005_s25, 4  ;;  %s32_s26 = int_to_ptr.vmem [resolvable:$true] %s31_s26 }
   0xf   :  { %s986_s27 = scalar_lea.vmem %s32_s26, 3072  ;;  %p991_p6 = scmp.lt.s32.totalorder %s32_s26, %s32_s26 }
  0x10   :  { %p987_p5 = scmp.ne.s32.totalorder %s32_s26, %s986_s27  ;;  %p992_p7 = scmp.lt.s32.totalorder %s986_s27, %s986_s27 }
  0x12   :  { %p993_p8 = por %p992_p7, %p991_p6 }
  0x14   :  { %p994_p9 = pnand %p993_p8, %p987_p5 }
  0x16   :  { %997 = shalt.err (!%p994_p9)
}
  0x17   :  { %37 = dma.hbm_to_vmem [thread:$0]  %s1147_s2, 3072, %s32_s26, [#allocation5], %s1003_s21, %s1003_s21, %s1004_s22  }
  0x18   :  { %998 = dma.done.wait [#allocation3], 2048  }
  0x19   :  { %999 = vsyncadd [#allocation3], 4294965248 }
  0x1a   :  { %1000 = dma.done.wait [#allocation5], 3072  }
  0x1b   :  { %1001 = vsyncadd [#allocation5], 4294964224  ;;  %v1006_v0 = vmov 0.0   ;;  %v902_v1 = vld [vmem:[#allocation2 + $0x78] sm:$0xff]   ;;  %v904_v3 = vld [vmem:[#allocation2 + $0x70] sm:$0xff]   ;;  %vm1007_vm0 = vmmov 0   ;;  %v88_v36 = vlaneseq }
  0x1c   :  { %816 = vmatprep.subr.bf16.mxu1 %v1006_v0  ;;  %v903_v2 = vld [vmem:[#allocation2 + $0x38] sm:$0xff]   ;;  %758 = vmatprep.subr.bf16.mxu0 %v902_v1  ;;  %v905_v4 = vld [vmem:[#allocation2 + $0x30] sm:$0xff]   ;;  %v906_v5 = vld [vmem:[#allocation2 + $0x68] sm:$0xff]  }
  0x1d   :  { %759 = vmatpush3.bf16.msra.mxu0 %v903_v2  ;;  %v907_v6 = vld [vmem:[#allocation2 + $0x28] sm:$0xff]   ;;  %v908_v7 = vld [vmem:[#allocation2 + $0x60] sm:$0xff]   ;;  %v910_v9 = vld [vmem:[#allocation2 + $0x58] sm:$0xff]   ;;  %832 = vmatprep.mubr.msk.bf16.mxu1 %vm1007_vm0, %v1006_v0  ;;  %v1076_v37 = vshrl.u32 %v88_v36, 7 }
  0x1e   :  { %760 = vmatprep.subr.bf16.mxu0 %v904_v3  ;;  %v909_v8 = vld [vmem:[#allocation2 + $0x20] sm:$0xff]   ;;  %v911_v10 = vld [vmem:[#allocation2 + $0x18] sm:$0xff]   ;;  %v912_v11 = vld [vmem:[#allocation2 + $0x50] sm:$0xff]  }
  0x1f   :  { %v51_v12 = vld [vmem:[%s1145_s0 + $0x8] sm:$0xff]  ;;  %v53_v13 = vld [vmem:[%s1145_s0 + $0x18] sm:$0xff]  ;;  %v913_v14 = vld [vmem:[#allocation2 + $0x10] sm:$0xff]   ;;  %v90_v38 = vsub.s32 0, %v1076_v37  ;;  %v250_v60 = vsub.s32 1, %v1076_v37 }
  0x20   :  { %v55_v15 = vpack.c.bf16 %v53_v13, %v51_v12  ;;  %v918_v16 = vld [vmem:[#allocation4 + $0x38] sm:$0xff]   ;;  %v914_v17 = vld [vmem:[#allocation2 + $0x48] sm:$0xff]   ;;  %v919_v18 = vld [vmem:[#allocation4 + $0x30] sm:$0xff]  }
  0x21   :  { %761 = vmatpush3.bf16.msra.mxu0 %v905_v4  ;;  %817 = vmatpush3.bf16.msra.mxu1 %v918_v16  ;;  %v915_v19 = vld [vmem:[#allocation2 + $0x8] sm:$0xff]   ;;  %v916_v20 = vld [vmem:[#allocation2 + $0x40] sm:$0xff]   ;;  %v52_v24 = vld [vmem:[%s1145_s0 + $0x10] sm:$0xff]  ;;  %v363_v16 = vsub.s32 2, %v1076_v37 }
  0x22   :  { %762 = vmatprep.subr.bf16.mxu0 %v906_v5  ;;  %220 = vmatprep.mubr.bf16.mxu0 %v55_v15  ;;  %v920_v21 = vld [vmem:[#allocation4 + $0x28] sm:$0xff]   ;;  %v917_v22 = vld [vmem:[#allocation2] sm:$0xff]   ;;  %v922_v27 = vld [vmem:[#allocation4 + $0x18] sm:$0xff]  }
  0x23   :  { %818 = vmatprep.subr.bf16.mxu1 %v1006_v0  ;;  %v50_v23 = vld [vmem:[%s1145_s0] sm:$0xff]  ;;  %v923_v28 = vld [vmem:[#allocation4 + $0x10] sm:$0xff]   ;;  %v924_v29 = vld [vmem:[#allocation4 + $0x8] sm:$0xff]  }
  0x24   :  { %v921_v25 = vld [vmem:[#allocation4 + $0x20] sm:$0xff]   ;;  %v54_v26 = vpack.c.bf16 %v52_v24, %v50_v23  ;;  %v926_v31 = vld [vmem:[#allocation4 + $0x78] sm:$0xff]   ;;  %v927_v32 = vld [vmem:[#allocation4 + $0x70] sm:$0xff]  }
  0x25   :  { %763 = vmatpush3.bf16.msra.mxu0 %v907_v6  ;;  %819 = vmatpush3.bf16.msra.mxu1 %v919_v18  ;;  %v925_v30 = vld [vmem:[#allocation4] sm:$0xff]   ;;  %v928_v33 = vld [vmem:[#allocation4 + $0x68] sm:$0xff]   ;;  %v930_v35 = vld [vmem:[#allocation4 + $0x58] sm:$0xff]  }
  0x26   :  { %764 = vmatprep.subr.bf16.mxu0 %v908_v7  ;;  %820 = vmatprep.subr.bf16.mxu1 %v1006_v0  ;;  %v929_v34 = vld [vmem:[#allocation4 + $0x60] sm:$0xff]   ;;  %v931_v52 = vld [vmem:[#allocation4 + $0x50] sm:$0xff]   ;;  %v932_v53 = vld [vmem:[#allocation4 + $0x48] sm:$0xff]  }
  0x27   :  { %v1082_v40 = vld [vmem:[%s1149_s4] sm:$0x1f]  ;;  %v934_v55 = vld [vmem:[#allocation4 + $0xb8] sm:$0xff]   ;;  %v935_v56 = vld [vmem:[#allocation4 + $0xb0] sm:$0xff]  }
  0x28   :  { %v91_v42 = vrot.slane %v1082_v40, %v90_v38  ;;  %v933_v54 = vld [vmem:[#allocation4 + $0x40] sm:$0xff]   ;;  %v936_v57 = vld [vmem:[#allocation4 + $0xa8] sm:$0xff]   ;;  %v938_v59 = vld [vmem:[#allocation4 + $0x98] sm:$0xff]   ;;  %v251_v61 = vrot.slane %v1082_v40, %v250_v60 }
  0x29   :  { %765 = vmatpush3.bf16.msra.mxu0 %v909_v8  ;;  %821 = vmatpush3.bf16.msra.mxu1 %v920_v21  ;;  %v937_v58 = vld [vmem:[#allocation4 + $0xa0] sm:$0xff]   ;;  %v939_v8 = vld [vmem:[#allocation4 + $0x90] sm:$0xff]   ;;  %v944_v13 = vld [vmem:[%s1148_s3 + $0x28] sm:$0xff]  }
  0x2a   :  { %766 = vmatprep.subr.bf16.mxu0 %v910_v9  ;;  %822 = vmatprep.subr.bf16.mxu1 %v1006_v0  ;;  %v940_v9 = vld [vmem:[#allocation4 + $0x88] sm:$0xff]   ;;  %v943_v12 = vld [vmem:[%s1148_s3 + $0x30] sm:$0xff]   ;;  %v946_v15 = vld [vmem:[%s1148_s3 + $0x18] sm:$0xff]  }
  0x2d   :  { %767 = vmatpush3.bf16.msra.mxu0 %v911_v10  ;;  %823 = vmatpush3.bf16.msra.mxu1 %v921_v25  ;;  %v941_v10 = vld [vmem:[#allocation4 + $0x80] sm:$0xff]  }
  0x2e   :  { %768 = vmatprep.subr.bf16.mxu0 %v912_v11  ;;  %824 = vmatprep.subr.bf16.mxu1 %v1006_v0  ;;  %v942_v11 = vld [vmem:[%s1148_s3 + $0x38] sm:$0xff]  }
  0x31   :  { %769 = vmatpush3.bf16.msra.mxu0 %v913_v14  ;;  %825 = vmatpush3.bf16.msra.mxu1 %v922_v27  ;;  %v945_v14 = vld [vmem:[%s1148_s3 + $0x20] sm:$0xff]   ;;  %v947_v27 = vld [vmem:[%s1148_s3 + $0x10] sm:$0xff]  }
  0x32   :  { %770 = vmatprep.subr.bf16.mxu0 %v914_v17  ;;  %826 = vmatprep.subr.bf16.mxu1 %v1006_v0  ;;  %v364_v17 = vrot.slane %v1082_v40, %v363_v16 }
  0x35   :  { %771 = vmatpush3.bf16.msra.mxu0 %v915_v19  ;;  %827 = vmatpush3.bf16.msra.mxu1 %v923_v28  ;;  %v948_v28 = vld [vmem:[%s1148_s3 + $0x8] sm:$0xff]  }
  0x36   :  { %772 = vmatprep.subr.bf16.mxu0 %v916_v20  ;;  %828 = vmatprep.subr.bf16.mxu1 %v1006_v0 }
  0x39   :  { %773 = vmatpush3.bf16.msra.mxu0 %v917_v22  ;;  %829 = vmatpush3.bf16.msra.mxu1 %v924_v29  ;;  %v949_v29 = vld [vmem:[%s1148_s3] sm:$0xff]  }
  0x3a   :  { %836 = vmatprep.subr.bf16.mxu0 %v1006_v0  ;;  %830 = vmatprep.subr.bf16.mxu1 %v1006_v0 }
  0x3c   :  { %221 = vmatmul.mubr.bf16.vlgmr.msra.gmra.mxu0 %v54_v26 }
  0x3d   :  { %831 = vmatpush3.bf16.msra.mxu1 %v925_v30  ;;  %852 = vmatprep.mubr.msk.bf16.mxu0 %vm1007_vm0, %v1006_v0  ;;  %v476_v30 = vsub.s32 3, %v1076_v37 }
  0x3e   :  { %856 = vmatprep.subr.bf16.mxu1 %v1006_v0  ;;  %837 = vmatpush3.bf16.msra.mxu0 %v926_v31 }
  0x3f   :  { %838 = vmatprep.subr.bf16.mxu0 %v1006_v0  ;;  %v477_v31 = vrot.slane %v1082_v40, %v476_v30 }
  0x42   :  { %839 = vmatpush3.bf16.msra.mxu0 %v927_v32 }
  0x43   :  { %840 = vmatprep.subr.bf16.mxu0 %v1006_v0 }
  0x46   :  { %841 = vmatpush3.bf16.msra.mxu0 %v928_v33 }
  0x47   :  { %842 = vmatprep.subr.bf16.mxu0 %v1006_v0 }
  0x4a   :  { %843 = vmatpush3.bf16.msra.mxu0 %v929_v34 }
  0x4b   :  { %844 = vmatprep.subr.bf16.mxu0 %v1006_v0 }
  0x4e   :  { %845 = vmatpush3.bf16.msra.mxu0 %v930_v35 }
  0x4f   :  { %846 = vmatprep.subr.bf16.mxu0 %v1006_v0 }
  0x52   :  { %847 = vmatpush3.bf16.msra.mxu0 %v931_v52 }
  0x53   :  { %848 = vmatprep.subr.bf16.mxu0 %v1006_v0 }
  0x56   :  { %849 = vmatpush3.bf16.msra.mxu0 %v932_v53 }
  0x57   :  { %850 = vmatprep.subr.bf16.mxu0 %v1006_v0 }
  0x5a   :  { %851 = vmatpush3.bf16.msra.mxu0 %v933_v54 }
  0x5b   :  { %876 = vmatprep.subr.bf16.mxu0 %v1006_v0 }
  0xfc   :  { %v774_v39 = vpop.f32.mrf.mxu0 }
  0xfe   :  { %v775_v41 = vpop.f32.mrf.mxu0 }
  0xff   :  { %v776_v43 = vadd.f32 %v775_v41, %v774_v39 }
 0x100   :  { %v777_v44 = vpop.f32.mrf.mxu0 }
 0x101   :  { %v223_v46 = vadd.f32 %v776_v43, %v91_v42 }
 0x102   :  { %v778_v45 = vpop.f32.mrf.mxu0 }
 0x103   :  { %v779_v47 = vadd.f32 %v778_v45, %v777_v44  ;;  %v229_v49 = vmax.f32 %v223_v46, 0.0  ;;  %v680_v44 = vand.u32 127, %v88_v36 }
 0x105   :  { %v226_v48 = vadd.f32 %v779_v47, %v91_v42  ;;  %vm681_vm1 = vcmp.lt.s32.totalorder %v680_v44, 4 }
 0x107   :  { %v230_v50 = vmax.f32 %v226_v48, 0.0 }
 0x109   :  { %v231_v51 = vpack.c.bf16 %v230_v50, %v229_v49 }
 0x10b   :  { %833 = vmatmul.mubr.bf16.vlgmr.msra.gmra.mxu1 %v231_v51 }
 0x10c   :  { %872 = vmatprep.mubr.msk.bf16.mxu1 %vm1007_vm0, %v1006_v0  ;;  %857 = vmatpush3.bf16.msra.mxu1 %v934_v55 }
 0x10d   :  { %858 = vmatprep.subr.bf16.mxu1 %v1006_v0 }
 0x110   :  { %859 = vmatpush3.bf16.msra.mxu1 %v935_v56 }
 0x111   :  { %860 = vmatprep.subr.bf16.mxu1 %v1006_v0 }
 0x114   :  { %861 = vmatpush3.bf16.msra.mxu1 %v936_v57 }
 0x115   :  { %862 = vmatprep.subr.bf16.mxu1 %v1006_v0 }
 0x118   :  { %863 = vmatpush3.bf16.msra.mxu1 %v937_v58 }
 0x119   :  { %864 = vmatprep.subr.bf16.mxu1 %v1006_v0 }
 0x11c   :  { %865 = vmatpush3.bf16.msra.mxu1 %v938_v59 }
 0x11d   :  { %866 = vmatprep.subr.bf16.mxu1 %v1006_v0 }
 0x120   :  { %867 = vmatpush3.bf16.msra.mxu1 %v939_v8 }
 0x121   :  { %868 = vmatprep.subr.bf16.mxu1 %v1006_v0 }
 0x124   :  { %869 = vmatpush3.bf16.msra.mxu1 %v940_v9 }
 0x125   :  { %870 = vmatprep.subr.bf16.mxu1 %v1006_v0 }
 0x128   :  { %871 = vmatpush3.bf16.msra.mxu1 %v941_v10 }
 0x1cb   :  { %v334_v62 = vpop.f32.mrf.mxu1 }
 0x1cc   :  { %v335_v1 = vadd.f32 %v334_v62, %v251_v61 }
 0x1cd   :  { %v834_v63 = vpop.f32.mrf.mxu1 }
 0x1ce   :  { %v341_v5 = vmax.f32 %v335_v1, 0.0 }
 0x1cf   :  { %v337_v2 = vpop.f32.mrf.mxu1 }
 0x1d0   :  { %v338_v3 = vadd.f32 %v337_v2, %v251_v61 }
 0x1d1   :  { %v835_v4 = vpop.f32.mrf.mxu1 }
 0x1d2   :  { %v342_v6 = vmax.f32 %v338_v3, 0.0 }
 0x1d4   :  { %v343_v7 = vpack.c.bf16 %v342_v6, %v341_v5 }
 0x1d6   :  { %853 = vmatmul.mubr.bf16.vlgmr.msra.gmra.mxu0 %v343_v7 }
 0x1d7   :  { %892 = vmatprep.mubr.msk.bf16.mxu0 %vm1007_vm0, %v1006_v0  ;;  %877 = vmatpush3.bf16.msra.mxu0 %v942_v11 }
 0x1d8   :  { %878 = vmatprep.subr.bf16.mxu0 %v1006_v0 }
 0x1db   :  { %879 = vmatpush3.bf16.msra.mxu0 %v943_v12 }
 0x1dc   :  { %880 = vmatprep.subr.bf16.mxu0 %v1006_v0 }
 0x1df   :  { %881 = vmatpush3.bf16.msra.mxu0 %v944_v13 }
 0x1e0   :  { %882 = vmatprep.subr.bf16.mxu0 %v1006_v0 }
 0x1e3   :  { %883 = vmatpush3.bf16.msra.mxu0 %v945_v14 }
 0x1e4   :  { %884 = vmatprep.subr.bf16.mxu0 %v1006_v0 }
 0x1e7   :  { %885 = vmatpush3.bf16.msra.mxu0 %v946_v15 }
 0x1e8   :  { %886 = vmatprep.subr.bf16.mxu0 %v1006_v0 }
 0x1eb   :  { %887 = vmatpush3.bf16.msra.mxu0 %v947_v27 }
 0x1ec   :  { %888 = vmatprep.subr.bf16.mxu0 %v1006_v0 }
 0x1ef   :  { %889 = vmatpush3.bf16.msra.mxu0 %v948_v28 }
 0x1f0   :  { %890 = vmatprep.subr.bf16.mxu0 %v1006_v0  ;;  %v588_v0 = vsub.s32 4, %v1076_v37 }
 0x1f2   :  { %v589_v45 = vrot.slane %v1082_v40, %v588_v0 }
 0x1f3   :  { %891 = vmatpush3.bf16.msra.mxu0 %v949_v29 }
 0x296   :  { %v447_v18 = vpop.f32.mrf.mxu0 }
 0x297   :  { %v448_v20 = vadd.f32 %v447_v18, %v364_v17 }
 0x298   :  { %v854_v19 = vpop.f32.mrf.mxu0 }
 0x299   :  { %v454_v24 = vmax.f32 %v448_v20, 0.0 }
 0x29a   :  { %v450_v21 = vpop.f32.mrf.mxu0 }
 0x29b   :  { %v451_v22 = vadd.f32 %v450_v21, %v364_v17 }
 0x29c   :  { %v855_v23 = vpop.f32.mrf.mxu0 }
 0x29d   :  { %v455_v25 = vmax.f32 %v451_v22, 0.0 }
 0x29f   :  { %v456_v26 = vpack.c.bf16 %v455_v25, %v454_v24 }
 0x2a1   :  { %873 = vmatmul.mubr.bf16.vlgmr.msra.gmra.mxu1 %v456_v26 }
 0x361   :  { %v560_v32 = vpop.f32.mrf.mxu1 }
 0x362   :  { %v561_v34 = vadd.f32 %v560_v32, %v477_v31 }
 0x363   :  { %v874_v33 = vpop.f32.mrf.mxu1 }
 0x364   :  { %v567_v41 = vmax.f32 %v561_v34, 0.0 }
 0x365   :  { %v563_v35 = vpop.f32.mrf.mxu1 }
 0x366   :  { %v564_v38 = vadd.f32 %v563_v35, %v477_v31 }
 0x367   :  { %v875_v39 = vpop.f32.mrf.mxu1 }
 0x368   :  { %v568_v42 = vmax.f32 %v564_v38, 0.0 }
 0x36a   :  { %v569_v43 = vpack.c.bf16 %v568_v42, %v567_v41 }
 0x36c   :  { %893 = vmatmul.mubr.bf16.vlgmr.msra.gmra.mxu0 %v569_v43 }
 0x42c   :  { %v672_v46 = vpop.f32.mrf.mxu0 }
 0x42d   :  { %v673_v47 = vadd.f32 %v672_v46, %v589_v45 }
 0x42e   :  { %v894_v48 = vpop.f32.mrf.mxu0 }
 0x42f   :  { %v682_v49 = vsel %vm681_vm1, %v673_v47, -inf }
 0x430   :  { %684 = vmax.xlane.f32.xlu0 %v682_v49  ;;  %v675_v50 = vpop.f32.mrf.mxu0 }
 0x431   :  { %v676_v51 = vadd.f32 %v675_v50, %v589_v45 }
 0x432   :  { %v895_v52 = vpop.f32.mrf.mxu0 }
 0x433   :  { %v683_v53 = vsel %vm681_vm1, %v676_v51, -inf }
 0x434   :  { %686 = vmax.xlane.f32.xlu0 %v683_v53 }
 0x4b9   :  { %v685_v54 = vpop.xlane.xlu0 %684 }
 0x4ba   :  { %v688_v55 = vsub.f32 %v682_v49, %v685_v54 }
 0x4bc   :  { %v690_v56 = vmul.f32 1.442695, %v688_v55 }
 0x4bd   :  { %v687_v57 = vpop.xlane.xlu0 %686 }
 0x4be   :  { %950 = vpow2.f32 %v690_v56  ;;  %v689_v37 = vsub.f32 %v683_v53, %v687_v57 }
 0x4c0   :  { %v692_v36 = vmul.f32 1.442695, %v689_v37 }
 0x4c2   :  { %952 = vpow2.f32 %v692_v36 }
 0x4cb   :  { %v951_v40 = vpop.eup %950 }
 0x4cc   :  { %694 = vadd.xlane.f32.xlu1 %v951_v40 }
 0x4cf   :  { %v953_v58 = vpop.eup %952 }
 0x4d0   :  { %696 = vadd.xlane.f32.xlu1 %v953_v58 }
 0x555   :  { %v695_v59 = vpop.xlane.xlu1 %694 }
 0x556   :  { %954 = vrcp.f32 %v695_v59 }
 0x559   :  { %v697_v60 = vpop.xlane.xlu1 %696 }
 0x55a   :  { %956 = vrcp.f32 %v697_v60 }
 0x563   :  { %v955_v61 = vpop.eup %954 }
 0x564   :  { %v700_v62 = vmul.f32 %v955_v61, %v951_v40 }
 0x566   :  { %702 = vst [vmem:[%s1150_s5] sm:$0xff] %v700_v62 }
 0x567   :  { %v957_v63 = vpop.eup %956 }
 0x568   :  { %v701_v1 = vmul.f32 %v957_v63, %v953_v58 }
 0x56a   :  { %703 = vst [vmem:[%s1150_s5 + $0x8] sm:$0xff] %v701_v1 }
 0x56b   :  { %708 = vsyncpa [#allocation3], 1 }
 0x56c   :  { %709 = vsyncpa [#allocation5], 1 }

</bundles_post_ra>
